<compile_context>
chip_gen: v6e
topology: v6e:2x2x1
jax: 0.10.0
libtpu: 0.0.40
codegen_flags: <defaults>
</compile_context>

<pallas_src>
import math
import functools

import jax
import jax.numpy as jnp
from jax.experimental import pallas as pl
from jax.experimental.pallas import tpu as pltpu


LANE = 128     # vreg lane width — hidden feature dims padded to this once
SUBLANE16 = 16  # bf16 sublane packing — round the batch to this


def _round_up(x, m):
    return ((x + m - 1) // m) * m


def _pad2d(a, rows, cols, dtype):
    """Zero-pad a 2-D array up to (rows, cols) and cast."""
    out = jnp.zeros((rows, cols), dtype)
    return out.at[:a.shape[0], :a.shape[1]].set(a.astype(dtype))


# --------------------------------------------------------------------------
# Kernel: fused fc1+relu -> fc2+relu -> fc3+tanh on one batch tile.
# bf16 MXU operands, f32 accumulation, f32 epilogue (no bf16 VPU/EUP on v5e).
# --------------------------------------------------------------------------
def policy_forward_kernel(x_ref, w1_ref, b1_ref, w2_ref, b2_ref,
                          w3_ref, b3_ref, o_ref):
    # fc1 + ReLU
    h1 = jnp.dot(x_ref[...], w1_ref[...], preferred_element_type=jnp.float32)
    h1 = jnp.maximum(h1 + b1_ref[...], 0.0)
    # fc2 + ReLU
    h2 = jnp.dot(h1.astype(jnp.bfloat16), w2_ref[...],
                 preferred_element_type=jnp.float32)
    h2 = jnp.maximum(h2 + b2_ref[...], 0.0)
    # fc3 + tanh  (narrow (tb, n_actions) store)
    h3 = jnp.dot(h2.astype(jnp.bfloat16), w3_ref[...],
                 preferred_element_type=jnp.float32)
    o_ref[...] = jnp.tanh(h3 + b3_ref[...])


# --------------------------------------------------------------------------
# One-time parameter preparation (pad hidden dims to 128 lanes, cast to bf16).
# Do this once when the network is (re)built, NOT per forward call.
# --------------------------------------------------------------------------
def prepare_params(w1, b1, w2, b2, w3, b3):
    d_in, fc1_dims = w1.shape
    fc2_dims = w2.shape[1]
    n_actions = w3.shape[1]
    f1_p = _round_up(fc1_dims, LANE)
    f2_p = _round_up(fc2_dims, LANE)
    # input dim (d_in) and output dim (n_actions) are NOT padded.
    w1_p = _pad2d(w1, d_in, f1_p, jnp.bfloat16)
    b1_p = _pad2d(b1, 1, f1_p, jnp.float32)
    w2_p = _pad2d(w2, f1_p, f2_p, jnp.bfloat16)
    b2_p = _pad2d(b2, 1, f2_p, jnp.float32)
    w3_p = _pad2d(w3, f2_p, n_actions, jnp.bfloat16)
    b3_p = _pad2d(b3, 1, n_actions, jnp.float32)
    return (w1_p, b1_p, w2_p, b2_p, w3_p, b3_p)


# --------------------------------------------------------------------------
# Forward pass.
# --------------------------------------------------------------------------
@functools.partial(jax.jit, static_argnames=("grid_steps",))
def _policy_forward_padded(state, params, *, grid_steps=1):
    w1_p, b1_p, w2_p, b2_p, w3_p, b3_p = params
    B, d_in = state.shape
    n_actions = w3_p.shape[1]

    gs = grid_steps
    # Round batch to 16*gs: bf16-native sublane tile per grid step, and no
    # over-rounding to a large fixed tile (old code padded 300 -> 512 rows).
    b_p = _round_up(B, SUBLANE16 * gs)
    tb = b_p // gs

    # Narrow bf16 input stream: (b_p, d_in), no lane padding.
    x_p = jnp.zeros((b_p, d_in), jnp.bfloat16)
    x_p = x_p.at[:B, :].set(state.astype(jnp.bfloat16))

    # Weights/biases: constant index_map -> VMEM-resident across the grid.
    resident = lambda a: pl.BlockSpec(a.shape, lambda i: (0, 0))

    out_p = pl.pallas_call(
        policy_forward_kernel,
        out_shape=jax.ShapeDtypeStruct((b_p, n_actions), jnp.float32),
        grid=(gs,),
        in_specs=[pl.BlockSpec((tb, d_in), lambda i: (i, 0)),
                  resident(w1_p), resident(b1_p),
                  resident(w2_p), resident(b2_p),
                  resident(w3_p), resident(b3_p)],
        out_specs=pl.BlockSpec((tb, n_actions), lambda i: (i, 0)),
        compiler_params=pltpu.CompilerParams(
            dimension_semantics=("parallel",)),
    )(x_p, w1_p, b1_p, w2_p, b2_p, w3_p, b3_p)

    # Drop batch padding (cheap: output is already action-width, not 128).
    return out_p[:B, :]


def _default_grid_steps(batch):
    """1 grid step on single-TC parts (v5e/v6e); 2 on v7x for large batches
    so the parallel grid axis shards the batch across both TensorCores."""
    if batch < 256:
        return 1
    try:
        kind = jax.devices()[0].device_kind.lower()
    except Exception:  # pragma: no cover - defensive
        return 1
    return 2 if ("v7" in kind or "7x" in kind) else 1


def policy_forward(state, params, grid_steps=None):
    if grid_steps is None:
        grid_steps = _default_grid_steps(state.shape[0])
    return _policy_forward_padded(state, params, grid_steps=grid_steps)


# --------------------------------------------------------------------------
# Init helpers matching the PyTorch module.
# --------------------------------------------------------------------------
def init_linear(key, fan_in, fan_out):
    """PyTorch nn.Linear default init: U(-1/sqrt(fan_in), 1/sqrt(fan_in))."""
    kw, kb = jax.random.split(key)
    bound = 1.0 / math.sqrt(fan_in)
    # stored as (in, out) == transpose of torch's (out, in)
    w = jax.random.uniform(kw, (fan_in, fan_out), jnp.float32, -bound, bound)
    b = jax.random.uniform(kb, (1, fan_out), jnp.float32, -bound, bound)
    return w, b


def init_final_linear(key, fan_in, fan_out, init_w=0.003):
    """fc3: weight & bias overridden to U(-init_w, init_w) in __init__."""
    kw, kb = jax.random.split(key)
    w = jax.random.uniform(kw, (fan_in, fan_out), jnp.float32, -init_w, init_w)
    b = jax.random.uniform(kb, (1, fan_out), jnp.float32, -init_w, init_w)
    return w, b


def _ref_forward(state, w1, b1, w2, b2, w3, b3):
    """Pure-JAX f32 reference of the module's forward."""
    h1 = jnp.maximum(state @ w1 + b1, 0.0)
    h2 = jnp.maximum(h1 @ w2 + b2, 0.0)
    return jnp.tanh(h2 @ w3 + b3)


if __name__ == "__main__":
    # Small shapes consistent with the MLP forward:
    #   input_dims = (16,), fc_dims -> (64, 32), n_actions = 4, batch = 8
    B, D_IN, FC1, FC2, N_ACTIONS = 8, 16, 64, 32, 4

    key = jax.random.PRNGKey(0)
    k_state, k_big, k1, k2, k3 = jax.random.split(key, 5)

    state = jax.random.normal(k_state, (B, D_IN), jnp.float32)
    w1, b1 = init_linear(k1, D_IN, FC1)
    w2, b2 = init_linear(k2, FC1, FC2)
    w3, b3 = init_final_linear(k3, FC2, N_ACTIONS)

    # One-time parameter prep (padding + bf16 cast hoisted out of the call).
    params = jax.tree_util.tree_map(jax.block_until_ready,
                                    prepare_params(w1, b1, w2, b2, w3, b3))

    # --- small batch: single grid step ---
    out = policy_forward(state, params)
    out = jax.block_until_ready(out)
    ref = _ref_forward(state, w1, b1, w2, b2, w3, b3)
    assert out.shape == (B, N_ACTIONS)
    # bf16 MXU operands / activations vs f32 reference -> loose-ish tolerance.
    assert jnp.allclose(out, ref, atol=2e-2), "mismatch vs reference (small B)"

    # --- larger, non-16-aligned batch: exercises batch rounding + grid ---
    B_BIG = 300
    state_big = jax.random.normal(k_big, (B_BIG, D_IN), jnp.float32)
    out_big = policy_forward(state_big, params)
    out_big = jax.block_until_ready(out_big)
    ref_big = _ref_forward(state_big, w1, b1, w2, b2, w3, b3)
    assert out_big.shape == (B_BIG, N_ACTIONS)
    assert jnp.allclose(out_big, ref_big, atol=2e-2), "mismatch vs reference (big B)"

    # --- explicit 2-step parallel grid (what v7x would pick automatically) ---
    out_2 = policy_forward(state_big, params, grid_steps=2)
    out_2 = jax.block_until_ready(out_2)
    assert jnp.allclose(out_2, ref_big, atol=2e-2), "mismatch vs reference (2-step grid)"

    # TODO(synk): optional conv path (cnn_dims) not implemented; the module's
    # for/else makes total_fc_input_dims = prod(input_dims) anyway, so the MLP
    # path is the meaningful forward.
    print("KERNEL_OK")
</pallas_src>

<mosaic_0001>
module attributes {stable_mosaic.version = 11 : i64} {
  func.func @policy_forward_kernel(%arg0: i32, %arg1: memref<16x16xbf16, #tpu.memory_space<vmem>>, %arg2: memref<16x128xbf16, #tpu.memory_space<vmem>>, %arg3: memref<1x128xf32, #tpu.memory_space<vmem>>, %arg4: memref<128x128xbf16, #tpu.memory_space<vmem>>, %arg5: memref<1x128xf32, #tpu.memory_space<vmem>>, %arg6: memref<128x4xbf16, #tpu.memory_space<vmem>>, %arg7: memref<1x4xf32, #tpu.memory_space<vmem>>, %arg8: memref<16x4xf32, #tpu.memory_space<vmem>>) attributes {dimension_semantics = [#tpu.dimension_semantics<parallel>], iteration_bounds = array<i64: 1>, scalar_prefetch = 0 : i64, scratch_operands = 0 : i64, tpu.core_type = #tpu.core_type<tc>, window_params = [{transform_indices = @transform_0, window_bounds = array<i64: 16, 16>}, {pipeline_mode = #tpu.pipeline_mode<synchronous>, transform_indices = @transform_1, window_bounds = array<i64: 16, 128>}, {pipeline_mode = #tpu.pipeline_mode<synchronous>, transform_indices = @transform_2, window_bounds = array<i64: 1, 128>}, {pipeline_mode = #tpu.pipeline_mode<synchronous>, transform_indices = @transform_3, window_bounds = array<i64: 128, 128>}, {pipeline_mode = #tpu.pipeline_mode<synchronous>, transform_indices = @transform_4, window_bounds = array<i64: 1, 128>}, {pipeline_mode = #tpu.pipeline_mode<synchronous>, transform_indices = @transform_5, window_bounds = array<i64: 128, 4>}, {pipeline_mode = #tpu.pipeline_mode<synchronous>, transform_indices = @transform_6, window_bounds = array<i64: 1, 4>}, {transform_indices = @transform_7, window_bounds = array<i64: 16, 4>}]} {
    %c0 = arith.constant 0 : index
    %c0_0 = arith.constant 0 : index
    %0 = vector.load %arg1[%c0, %c0_0] : memref<16x16xbf16, #tpu.memory_space<vmem>>, vector<16x16xbf16>
    %c0_1 = arith.constant 0 : index
    %c0_2 = arith.constant 0 : index
    %1 = vector.load %arg2[%c0_1, %c0_2] : memref<16x128xbf16, #tpu.memory_space<vmem>>, vector<16x128xbf16>
    %cst = arith.constant dense<0.000000e+00> : vector<16x128xf32>
    %2 = tpu.matmul %0, %1, %cst {dimension_numbers = #tpu.dot_dimension_numbers<[1], [0], [0], [1], [0, 0, 1, 1], [], []>} : vector<16x16xbf16>, vector<16x128xbf16>, vector<16x128xf32> -> vector<16x128xf32>
    %c0_3 = arith.constant 0 : index
    %c0_4 = arith.constant 0 : index
    %3 = vector.load %arg3[%c0_3, %c0_4] : memref<1x128xf32, #tpu.memory_space<vmem>>, vector<1x128xf32>
    %4 = vector.broadcast %3 : vector<1x128xf32> to vector<16x128xf32>
    %5 = arith.addf %2, %4 : vector<16x128xf32>
    %cst_5 = arith.constant 0.000000e+00 : f32
    %6 = vector.broadcast %cst_5 : f32 to vector<16x128xf32>
    %7 = arith.maximumf %5, %6 : vector<16x128xf32>
    %8 = arith.truncf %7 : vector<16x128xf32> to vector<16x128xbf16>
    %c0_6 = arith.constant 0 : index
    %c0_7 = arith.constant 0 : index
    %9 = vector.load %arg4[%c0_6, %c0_7] : memref<128x128xbf16, #tpu.memory_space<vmem>>, vector<128x128xbf16>
    %cst_8 = arith.constant dense<0.000000e+00> : vector<16x128xf32>
    %10 = tpu.matmul %8, %9, %cst_8 {dimension_numbers = #tpu.dot_dimension_numbers<[1], [0], [0], [1], [0, 0, 1, 1], [], []>} : vector<16x128xbf16>, vector<128x128xbf16>, vector<16x128xf32> -> vector<16x128xf32>
    %c0_9 = arith.constant 0 : index
    %c0_10 = arith.constant 0 : index
    %11 = vector.load %arg5[%c0_9, %c0_10] : memref<1x128xf32, #tpu.memory_space<vmem>>, vector<1x128xf32>
    %12 = vector.broadcast %11 : vector<1x128xf32> to vector<16x128xf32>
    %13 = arith.addf %10, %12 : vector<16x128xf32>
    %cst_11 = arith.constant 0.000000e+00 : f32
    %14 = vector.broadcast %cst_11 : f32 to vector<16x128xf32>
    %15 = arith.maximumf %13, %14 : vector<16x128xf32>
    %16 = arith.truncf %15 : vector<16x128xf32> to vector<16x128xbf16>
    %c0_12 = arith.constant 0 : index
    %c0_13 = arith.constant 0 : index
    %17 = vector.load %arg6[%c0_12, %c0_13] : memref<128x4xbf16, #tpu.memory_space<vmem>>, vector<128x4xbf16>
    %cst_14 = arith.constant dense<0.000000e+00> : vector<16x4xf32>
    %18 = tpu.matmul %16, %17, %cst_14 {dimension_numbers = #tpu.dot_dimension_numbers<[1], [0], [0], [1], [0, 0, 1, 1], [], []>} : vector<16x128xbf16>, vector<128x4xbf16>, vector<16x4xf32> -> vector<16x4xf32>
    %c0_15 = arith.constant 0 : index
    %c0_16 = arith.constant 0 : index
    %19 = vector.load %arg7[%c0_15, %c0_16] : memref<1x4xf32, #tpu.memory_space<vmem>>, vector<1x4xf32>
    %20 = vector.broadcast %19 : vector<1x4xf32> to vector<16x4xf32>
    %21 = arith.addf %18, %20 : vector<16x4xf32>
    %22 = math.tanh %21 : vector<16x4xf32>
    %c0_17 = arith.constant 0 : index
    %c0_18 = arith.constant 0 : index
    %23 = vector.load %arg8[%c0_17, %c0_18] : memref<16x4xf32, #tpu.memory_space<vmem>>, vector<16x4xf32>
    tpu.vector_store %arg8[%c0_17, %c0_18], %22 {strides = array<i32>} : memref<16x4xf32, #tpu.memory_space<vmem>>, vector<16x4xf32>,
    return
  }
  func.func @transform_0(%arg0: i32) -> (i32, i32) {
    %c0_i32 = arith.constant 0 : i32
    %c0_i32_0 = arith.constant 0 : i32
    return %arg0, %c0_i32 : i32, i32
  }
  func.func @transform_1(%arg0: i32) -> (i32, i32) {
    %c0_i32 = arith.constant 0 : i32
    %c0_i32_0 = arith.constant 0 : i32
    %c0_i32_1 = arith.constant 0 : i32
    return %c0_i32, %c0_i32_0 : i32, i32
  }
  func.func @transform_2(%arg0: i32) -> (i32, i32) {
    %c0_i32 = arith.constant 0 : i32
    %c0_i32_0 = arith.constant 0 : i32
    %c0_i32_1 = arith.constant 0 : i32
    return %c0_i32, %c0_i32_0 : i32, i32
  }
  func.func @transform_3(%arg0: i32) -> (i32, i32) {
    %c0_i32 = arith.constant 0 : i32
    %c0_i32_0 = arith.constant 0 : i32
    %c0_i32_1 = arith.constant 0 : i32
    return %c0_i32, %c0_i32_0 : i32, i32
  }
  func.func @transform_4(%arg0: i32) -> (i32, i32) {
    %c0_i32 = arith.constant 0 : i32
    %c0_i32_0 = arith.constant 0 : i32
    %c0_i32_1 = arith.constant 0 : i32
    return %c0_i32, %c0_i32_0 : i32, i32
  }
  func.func @transform_5(%arg0: i32) -> (i32, i32) {
    %c0_i32 = arith.constant 0 : i32
    %c0_i32_0 = arith.constant 0 : i32
    %c0_i32_1 = arith.constant 0 : i32
    return %c0_i32, %c0_i32_0 : i32, i32
  }
  func.func @transform_6(%arg0: i32) -> (i32, i32) {
    %c0_i32 = arith.constant 0 : i32
    %c0_i32_0 = arith.constant 0 : i32
    %c0_i32_1 = arith.constant 0 : i32
    return %c0_i32, %c0_i32_0 : i32, i32
  }
  func.func @transform_7(%arg0: i32) -> (i32, i32) {
    %c0_i32 = arith.constant 0 : i32
    %c0_i32_0 = arith.constant 0 : i32
    return %arg0, %c0_i32 : i32, i32
  }
}

</mosaic_0001>

<bundles_post_ra>
// kernel: _policy_forward_padded.1
= control target key start
LH: loop header
LB: loop body
LE: loop exit
PB: predicated region body
PF: predicated region fallthrough
CT: control target
= control target key end

     0   :  { %v445_v0 = vmov 0.0   ;;  %vm446_vm0 = vmmov 0   ;;  %vm49_vm1 = vcmask 130048   ;;  %vm326_vm2 = vcmask 31744   ;;  %s576_s1 = inlined_call_operand.vmem [shape: bf16[16,128], index: 1, kind: input, shape index: {}]   ;;  %s577_s0 = inlined_call_operand.vmem [shape: bf16[16,16], index: 0, kind: input, shape index: {}]   ;;  %s578_s3 = inlined_call_operand.vmem [shape: bf16[128,128], index: 3, kind: input, shape index: {}]   ;;  %s579_s5 = inlined_call_operand.vmem [shape: bf16[128,4], index: 5, kind: input, shape index: {}]   ;;  %s580_s2 = inlined_call_operand.vmem [shape: f32[1,128], index: 2, kind: input, shape index: {}]   ;;  %s581_s4 = inlined_call_operand.vmem [shape: f32[1,128], index: 4, kind: input, shape index: {}]   ;;  %s582_s6 = inlined_call_operand.vmem [shape: f32[1,4], index: 6, kind: input, shape index: {}]   ;;  %s583_s7 = inlined_call_operand.vmem [shape: f32[16,4], index: 7, kind: output, shape index: {}]  }
   0x1   :  { %375 = vmatprep.subr.bf16.mxu0 %v445_v0  ;;  %v423_v1 = vld [vmem:[%s576_s1] sm:$0xff]   ;;  %377 = vmatprep.mubr.msk.bf16.mxu0 %vm446_vm0, %v445_v0  ;;  %v425_v3 = vld [vmem:[%s578_s3 + $0x38] sm:$0xff]   ;;  %v426_v4 = vld [vmem:[%s578_s3 + $0x30] sm:$0xff]  }
   0x2   :  { %v424_v2 = vld [vmem:[%s577_s0] sm:$0xff]   ;;  %381 = vmatprep.subr.bf16.mxu1 %v445_v0  ;;  %397 = vmatprep.mubr.msk.bf16.mxu1 %vm446_vm0, %v445_v0  ;;  %v427_v5 = vld [vmem:[%s578_s3 + $0x28] sm:$0xff]   ;;  %v429_v7 = vld [vmem:[%s578_s3 + $0x18] sm:$0xff]  }
   0x3   :  { %376 = vmatpush3.bf16.msra.mxu0 %v423_v1  ;;  %382 = vmatpush3.bf16.msra.mxu1 %v425_v3  ;;  %v428_v6 = vld [vmem:[%s578_s3 + $0x20] sm:$0xff]   ;;  %v430_v8 = vld [vmem:[%s578_s3 + $0x10] sm:$0xff]   ;;  %v431_v9 = vld [vmem:[%s578_s3 + $0x8] sm:$0xff]  }
   0x4   :  { %401 = vmatprep.subr.bf16.mxu0 %v445_v0  ;;  %383 = vmatprep.subr.bf16.mxu1 %v445_v0  ;;  %v432_v10 = vld [vmem:[%s578_s3] sm:$0xff]   ;;  %v433_v11 = vld [vmem:[%s579_s5 + $0x38] sm:$0xff]   ;;  %v434_v12 = vld [vmem:[%s579_s5 + $0x30] sm:$0xff]  }
   0x5   :  { %v435_v13 = vld [vmem:[%s579_s5 + $0x28] sm:$0xff]   ;;  %v436_v14 = vld [vmem:[%s579_s5 + $0x20] sm:$0xff]   ;;  %v437_v15 = vld [vmem:[%s579_s5 + $0x18] sm:$0xff]  }
   0x6   :  { %378 = vmatmul.mubr.msk.bf16.vlgmr.msra.gmra.mxu0 %vm49_vm1, %v424_v2  ;;  %v333_v16 = vld [vmem:[%s580_s2] ss:$0 sm:$0xff]  ;;  %v438_v26 = vld [vmem:[%s579_s5 + $0x10] sm:$0xff]   ;;  %v439_v27 = vld [vmem:[%s579_s5 + $0x8] sm:$0xff]  }
   0x7   :  { %417 = vmatprep.mubr.msk.bf16.mxu0 %vm446_vm0, %v445_v0  ;;  %384 = vmatpush3.bf16.msra.mxu1 %v426_v4  ;;  %v440_v28 = vld [vmem:[%s579_s5] sm:$0xff]  }
   0x8   :  { %385 = vmatprep.subr.bf16.mxu1 %v445_v0  ;;  %402 = vmatpush3.bf16.msra.mxu0 %v433_v11  ;;  %v337_v29 = vld [vmem:[%s581_s4] ss:$0 sm:$0xff] }
   0x9   :  { %403 = vmatprep.subr.bf16.mxu0 %v445_v0  ;;  %v346_v39 = vld [vmem:[%s582_s6] ss:$0 sm:$0xff] }
   0xb   :  { %386 = vmatpush3.bf16.msra.mxu1 %v427_v5 }
   0xc   :  { %387 = vmatprep.subr.bf16.mxu1 %v445_v0  ;;  %404 = vmatpush3.bf16.msra.mxu0 %v434_v12 }
   0xd   :  { %405 = vmatprep.subr.bf16.mxu0 %v445_v0 }
   0xf   :  { %388 = vmatpush3.bf16.msra.mxu1 %v428_v6 }
  0x10   :  { %389 = vmatprep.subr.bf16.mxu1 %v445_v0  ;;  %406 = vmatpush3.bf16.msra.mxu0 %v435_v13 }
  0x11   :  { %407 = vmatprep.subr.bf16.mxu0 %v445_v0 }
  0x13   :  { %390 = vmatpush3.bf16.msra.mxu1 %v429_v7 }
  0x14   :  { %391 = vmatprep.subr.bf16.mxu1 %v445_v0  ;;  %408 = vmatpush3.bf16.msra.mxu0 %v436_v14 }
  0x15   :  { %409 = vmatprep.subr.bf16.mxu0 %v445_v0 }
  0x17   :  { %392 = vmatpush3.bf16.msra.mxu1 %v430_v8 }
  0x18   :  { %393 = vmatprep.subr.bf16.mxu1 %v445_v0  ;;  %410 = vmatpush3.bf16.msra.mxu0 %v437_v15 }
  0x19   :  { %411 = vmatprep.subr.bf16.mxu0 %v445_v0 }
  0x1b   :  { %394 = vmatpush3.bf16.msra.mxu1 %v431_v9 }
  0x1c   :  { %395 = vmatprep.subr.bf16.mxu1 %v445_v0  ;;  %412 = vmatpush3.bf16.msra.mxu0 %v438_v26 }
  0x1d   :  { %413 = vmatprep.subr.bf16.mxu0 %v445_v0 }
  0x1f   :  { %396 = vmatpush3.bf16.msra.mxu1 %v432_v10 }
  0x20   :  { %414 = vmatpush3.bf16.msra.mxu0 %v439_v27 }
  0x21   :  { %415 = vmatprep.subr.bf16.mxu0 %v445_v0 }
  0x24   :  { %416 = vmatpush3.bf16.msra.mxu0 %v440_v28 }
  0xc6   :  { %v87_v17 = vpop.f32.mrf.mxu0 }
  0xc7   :  { %v88_v19 = vadd.f32 %v333_v16, %v87_v17 }
  0xc8   :  { %v379_v18 = vpop.f32.mrf.mxu0 }
  0xc9   :  { %v94_v23 = vmax.f32 %v88_v19, 0.0 }
  0xca   :  { %v90_v20 = vpop.f32.mrf.mxu0 }
  0xcb   :  { %v91_v21 = vadd.f32 %v333_v16, %v90_v20 }
  0xcc   :  { %v380_v22 = vpop.f32.mrf.mxu0 }
  0xcd   :  { %v95_v24 = vmax.f32 %v91_v21, 0.0 }
  0xcf   :  { %v96_v25 = vpack.c.bf16 %v95_v24, %v94_v23 }
  0xd1   :  { %398 = vmatmul.mubr.bf16.vlgmr.msra.gmra.mxu1 %v96_v25 }
 0x191   :  { %v202_v30 = vpop.f32.mrf.mxu1 }
 0x192   :  { %v203_v32 = vadd.f32 %v337_v29, %v202_v30 }
 0x193   :  { %v399_v31 = vpop.f32.mrf.mxu1 }
 0x194   :  { %v209_v36 = vmax.f32 %v203_v32, 0.0 }
 0x195   :  { %v205_v33 = vpop.f32.mrf.mxu1 }
 0x196   :  { %v206_v34 = vadd.f32 %v337_v29, %v205_v33 }
 0x197   :  { %v400_v35 = vpop.f32.mrf.mxu1 }
 0x198   :  { %v210_v37 = vmax.f32 %v206_v34, 0.0 }
 0x19a   :  { %v211_v38 = vpack.c.bf16 %v210_v37, %v209_v36 }
 0x19c   :  { %418 = vmatmul.mubr.bf16.vlgmr.msra.gmra.mxu0 %v211_v38 }
 0x25c   :  { %v317_v40 = vpop.f32.mrf.mxu0 }
 0x25d   :  { %v318_v41 = vadd.f32 %v346_v39, %v317_v40 }
 0x25e   :  { %v419_v42 = vpop.f32.mrf.mxu0 }
 0x25f   :  { %441 = vtanh.f32 %v318_v41 }
 0x260   :  { %v320_v43 = vpop.f32.mrf.mxu0 }
 0x261   :  { %v321_v44 = vadd.f32 %v346_v39, %v320_v43 }
 0x262   :  { %v420_v45 = vpop.f32.mrf.mxu0 }
 0x263   :  { %443 = vtanh.f32 %v321_v44 }
 0x26c   :  { %v442_v46 = vpop.eup %441 }
 0x26d   :  { %327 = vst.msk [vmem:[%s583_s7] sm:$0xff] %vm326_vm2, %v442_v46 }
 0x270   :  { %v444_v47 = vpop.eup %443 }
 0x271   :  { %328 = vst.msk [vmem:[%s583_s7 + $0x8] sm:$0xff] %vm326_vm2, %v444_v47 }

</bundles_post_ra>
